<compile_context>
chip_gen: v7x
topology: tpu7x:2x2x1
jax: 0.10.0
libtpu: 0.0.40
codegen_flags: <defaults>
</compile_context>

<pallas_src>
import jax
import jax.numpy as jnp
from jax.experimental import pallas as pl
from jax.experimental.pallas import tpu as pltpu


def _hsigmoid_kernel(x_ref, o_ref):
    x = x_ref[...]
    # relu6(3x+3)/6 folded to clip(0.5x + 0.5, 0, 1); computed in the input
    # dtype (bf16 stays bf16 on the v6e/v7x VPU) -- pure VPU filler for a
    # memory-bound kernel.
    half = jnp.asarray(0.5, dtype=x.dtype)
    o_ref[...] = jnp.clip(x * half + half, 0, 1).astype(o_ref.dtype)


def _hsigmoid_jnp(x):
    half = jnp.asarray(0.5, dtype=x.dtype)
    return jnp.clip(x * half + half, 0, 1)


_LANE = 128
_SMALL_BYTES = 64 * 1024  # below this, dispatch/prologue dominate -> plain jnp


def _block_bytes_and_vmem_limit():
    """Per-generation block size and an explicit scoped-VMEM budget."""
    try:
        kind = jax.devices()[0].device_kind.lower()
    except Exception:
        kind = ""
    if "v7" in kind:
        # faster HBM -> amortize the ~0.35us/step overhead with bigger blocks;
        # 4 x 6 MiB = 24 MiB < 32 MiB scoped default and < 64 MiB physical.
        blk = 6 * 1024 * 1024
    elif "v5e" in kind or "v5 lite" in kind or "v5lite" in kind:
        # v5e scoped default is only 16 MiB; 4 x 3 MiB = 12 MiB keeps headroom.
        blk = 3 * 1024 * 1024
    else:
        # v6e / default: 4 x 4 MiB = 16 MiB, well under the 32 MiB default.
        blk = 4 * 1024 * 1024
    vmem_limit = 4 * blk + 2 * 1024 * 1024  # in+out double-buffered, plus slack
    return blk, vmem_limit


def _num_tensorcores():
    """Best-effort TC count; 1 on v5e/v6e, 2 on dual-TC chips if exposed."""
    try:
        return max(1, int(getattr(jax.devices()[0], "num_cores", 1) or 1))
    except Exception:
        return 1


def _pick_width(n):
    """Largest multiple of 128 (<= 8192) dividing n; None if n % 128 != 0."""
    for cand in range(8192, _LANE - 1, -_LANE):
        if n % cand == 0:
            return cand
    return None


def hsigmoid(x):
    """Applies Hsigmoid (relu6(3x+3)/6) elementwise to any-shaped array."""
    orig_shape = x.shape
    dtype = x.dtype
    n = x.size
    itemsize = jnp.dtype(dtype).itemsize

    W = _pick_width(n) if n else None
    # Fast paths: (a) n not a multiple of 128 -> a pad+slice round trip would
    # double HBM traffic, so let XLA fuse it; (b) tiny inputs where kernel
    # dispatch dominates.  Both keep traffic at exactly 1x read + 1x write.
    if W is None or n * itemsize < _SMALL_BYTES:
        return _hsigmoid_jnp(x)

    pack = max(8, 32 // itemsize)  # sublane packing: 8 f32, 16 bf16, 32 int8
    R = n // W
    x2d = jnp.ravel(x).reshape(R, W)  # contiguous reshape: no copy

    block_bytes, vmem_limit = _block_bytes_and_vmem_limit()
    # Row tile: as many rows as fit the per-generation block budget, aligned
    # to sublane packing.  No ">= 8 grid steps" shrink: on 1-TC chips the grid
    # is a serial loop, so bigger blocks are strictly better.
    tr = max(pack, (block_bytes // (W * itemsize)) // pack * pack)
    if R <= tr:
        tr = R  # single full-extent block ((8,128) rule waived at full extent)
        # Dual-TC chips only: split once so both cores get a block.
        if _num_tensorcores() > 1 and R >= 2 * pack:
            tr = ((R + 1) // 2 + pack - 1) // pack * pack
    grid = (pl.cdiv(R, tr),)  # ragged tail (if any) masked by Pallas

    out2d = pl.pallas_call(
        _hsigmoid_kernel,
        out_shape=jax.ShapeDtypeStruct((R, W), dtype),
        grid=grid,
        in_specs=[pl.BlockSpec((tr, W), lambda i: (i, 0))],
        out_specs=pl.BlockSpec((tr, W), lambda i: (i, 0)),
        compiler_params=pltpu.CompilerParams(
            dimension_semantics=("parallel",),
            vmem_limit_bytes=vmem_limit,
        ),
        cost_estimate=pl.CostEstimate(
            flops=3 * n, transcendentals=0, bytes_accessed=2 * n * itemsize
        ),
    )(x2d)

    return out2d.reshape(orig_shape)


def _hsigmoid_ref(x):
    # faithful to the PyTorch module: relu6(3*x + 3.0) / 6.0 (in f32)
    xf = x.astype(jnp.float32)
    return jnp.clip(3.0 * xf + 3.0, 0.0, 6.0) / 6.0


if __name__ == "__main__":
    key = jax.random.PRNGKey(0)
    k1, k2, k3, k4 = jax.random.split(key, 4)

    # 1) small conv-activation shape (~8 KiB) -> jnp fast path (dispatch-bound)
    x1 = jax.random.normal(k1, (2, 4, 16, 16), dtype=jnp.float32) * 2.0
    y1 = jax.block_until_ready(hsigmoid(x1))
    assert y1.shape == x1.shape and y1.dtype == x1.dtype
    assert jnp.allclose(y1.astype(jnp.float32), _hsigmoid_ref(x1), atol=1e-6, rtol=1e-6)

    # 2) medium shape -> single full-extent block through the Pallas kernel
    x2 = jax.random.normal(k2, (2, 8, 64, 64), dtype=jnp.float32) * 3.0
    y2 = jax.block_until_ready(hsigmoid(x2))
    assert y2.shape == x2.shape and y2.dtype == x2.dtype
    assert jnp.allclose(y2.astype(jnp.float32), _hsigmoid_ref(x2), atol=1e-6, rtol=1e-6)

    # 3) larger activation -> multi-step tiled Pallas path (cdiv grid, ragged tail)
    x3 = jax.random.normal(k3, (4, 32, 128, 128), dtype=jnp.float32) * 3.0
    y3 = jax.block_until_ready(hsigmoid(x3))
    assert y3.shape == x3.shape and y3.dtype == x3.dtype
    assert jnp.allclose(y3.astype(jnp.float32), _hsigmoid_ref(x3), atol=1e-6, rtol=1e-6)

    # 4) bf16 activations through the kernel (computed in bf16, loose tol vs f32 ref)
    x4 = jax.random.normal(k4, (2, 16, 64, 64), dtype=jnp.bfloat16) * 3.0
    y4 = jax.block_until_ready(hsigmoid(x4))
    assert y4.shape == x4.shape and y4.dtype == jnp.bfloat16
    assert jnp.allclose(y4.astype(jnp.float32), _hsigmoid_ref(x4), atol=1e-2, rtol=1e-2)

    # 5) odd, non-128-divisible shape -> ragged jnp fallback (no pad/slice passes)
    x5 = jax.random.normal(jax.random.PRNGKey(1), (3, 5, 7), dtype=jnp.float32)
    y5 = jax.block_until_ready(hsigmoid(x5))
    assert y5.shape == x5.shape and y5.dtype == x5.dtype
    assert jnp.allclose(y5.astype(jnp.float32), _hsigmoid_ref(x5), atol=1e-6, rtol=1e-6)

    print("KERNEL_OK")
</pallas_src>

<mosaic_0001>
module attributes {stable_mosaic.version = 11 : i64} {
  func.func @_hsigmoid_kernel(%arg0: i32, %arg1: memref<8x8192xf32, #tpu.memory_space<vmem>>, %arg2: memref<8x8192xf32, #tpu.memory_space<vmem>>) attributes {dimension_semantics = [#tpu.dimension_semantics<parallel>], iteration_bounds = array<i64: 1>, scalar_prefetch = 0 : i64, scratch_operands = 0 : i64, tpu.core_type = #tpu.core_type<tc>, window_params = [{transform_indices = @transform_0, window_bounds = array<i64: 8, 8192>}, {transform_indices = @transform_1, window_bounds = array<i64: 8, 8192>}]} {
    %c0 = arith.constant 0 : index
    %c0_0 = arith.constant 0 : index
    %0 = vector.load %arg1[%c0, %c0_0] : memref<8x8192xf32, #tpu.memory_space<vmem>>, vector<8x8192xf32>
    %cst = arith.constant 5.000000e-01 : f32
    %1 = vector.broadcast %cst : f32 to vector<8x8192xf32>
    %2 = arith.mulf %0, %1 : vector<8x8192xf32>
    %cst_1 = arith.constant 5.000000e-01 : f32
    %3 = vector.broadcast %cst_1 : f32 to vector<8x8192xf32>
    %4 = arith.addf %2, %3 : vector<8x8192xf32>
    %c0_i32 = arith.constant 0 : i32
    %c1_i32 = arith.constant 1 : i32
    %5 = arith.sitofp %c0_i32 : i32 to f32
    %6 = vector.broadcast %5 : f32 to vector<8x8192xf32>
    %7 = arith.maximumf %6, %4 : vector<8x8192xf32>
    %8 = arith.sitofp %c1_i32 : i32 to f32
    %9 = vector.broadcast %8 : f32 to vector<8x8192xf32>
    %10 = arith.minimumf %9, %7 : vector<8x8192xf32>
    %c0_2 = arith.constant 0 : index
    %c0_3 = arith.constant 0 : index
    %11 = vector.load %arg2[%c0_2, %c0_3] : memref<8x8192xf32, #tpu.memory_space<vmem>>, vector<8x8192xf32>
    tpu.vector_store %arg2[%c0_2, %c0_3], %10 {strides = array<i32>} : memref<8x8192xf32, #tpu.memory_space<vmem>>, vector<8x8192xf32>,
    return
  }
  func.func @transform_0(%arg0: i32) -> (i32, i32) {
    %c0_i32 = arith.constant 0 : i32
    %c0_i32_0 = arith.constant 0 : i32
    return %arg0, %c0_i32 : i32, i32
  }
  func.func @transform_1(%arg0: i32) -> (i32, i32) {
    %c0_i32 = arith.constant 0 : i32
    %c0_i32_0 = arith.constant 0 : i32
    return %arg0, %c0_i32 : i32, i32
  }
}

</mosaic_0001>

<bundles_post_ra>
// kernel: tpu_custom_call.1
= control target key start
LH: loop header
LB: loop body
LE: loop exit
PB: predicated region body
PF: predicated region fallthrough
CT: control target
= control target key end

     0   :  { %6 = vsyncpa [#allocation3], 0  ;;  %s506_s0 = inlined_call_operand.hbm [shape: f32[8,8192], index: 0, kind: input, shape index: {}]   ;;  %s507_s1 = inlined_call_operand.hbm [shape: f32[8,8192], index: 1, kind: output, shape index: {}]  }
   0x1   :  { %7 = vsyncpa [#allocation4], 0  ;;  %s470_s6 = smov [#allocation2]   ;;  %s422_s10 = scalar_lea.hbm %s506_s0, 8192 }
   0x2   :  { %s14_s7 = sshll.u32 %s470_s6, 4  ;;  %p423_p0 = scmp.ne.s32.totalorder %s506_s0, %s422_s10  ;;  %s15_s7 = int_to_ptr.vmem [resolvable:$true] %s14_s7 }
   0x3   :  { %p426_p1 = scmp.lt.u32.totalorder %s422_s10, %s506_s0 }
   0x5   :  { %p428_p2 = pnand %p426_p1, %p423_p0 }
   0x7   :  { %431 = shalt.err (!%p428_p2)
}
   0x8   :  { %s432_s15 = scalar_lea.vmem %s15_s7, 8192  ;;  %p437_p4 = scmp.lt.s32.totalorder %s15_s7, %s15_s7 }
   0x9   :  { %p433_p3 = scmp.ne.s32.totalorder %s15_s7, %s432_s15  ;;  %p438_p5 = scmp.lt.s32.totalorder %s432_s15, %s432_s15 }
   0xb   :  { %p439_p6 = por %p438_p5, %p437_p4 }
   0xd   :  { %p440_p7 = pnand %p439_p6, %p433_p3 }
   0xf   :  { %443 = shalt.err (!%p440_p7)
}
  0x10   :  { %17 = dma.hbm_to_vmem [thread:$0]  %s506_s0, 8192, %s15_s7, [#allocation3]  }
  0x11   :  { %466 = dma.done.wait [#allocation3], 8192  }
  0x12   :  { %467 = vsyncadd [#allocation3], 4294959104  ;;  %v21_v0 = vld [vmem:[#allocation2] sm:$0xff]  ;;  %v22_v1 = vld [vmem:[#allocation2 + $0x8] sm:$0xff]  ;;  %s471_s0 = smov [#allocation5]  }
  0x13   :  { %v23_v2 = vld [vmem:[#allocation2 + $0x10] sm:$0xff]  ;;  %v85_v3 = vmul.f32 0.5, %v21_v0  ;;  %v86_v4 = vmul.f32 0.5, %v22_v1  ;;  %v24_v6 = vld [vmem:[#allocation2 + $0x18] sm:$0xff]  ;;  %v25_v7 = vld [vmem:[#allocation2 + $0x20] sm:$0xff]  ;;  %s411_s18 = sshll.u32 %s471_s0, 4  ;;  %s412_s18 = int_to_ptr.vmem [resolvable:$true] %s411_s18 }
  0x14   :  { %v87_v5 = vmul.f32 0.5, %v23_v2  ;;  %v26_v8 = vld [vmem:[#allocation2 + $0x28] sm:$0xff]  ;;  %v88_v9 = vmul.f32 0.5, %v24_v6  ;;  %v89_v10 = vmul.f32 0.5, %v25_v7  ;;  %v27_v12 = vld [vmem:[#allocation2 + $0x30] sm:$0xff]  ;;  %v28_v13 = vld [vmem:[#allocation2 + $0x38] sm:$0xff]  ;;  %p449_p9 = scmp.lt.s32.totalorder %s412_s18, %s412_s18 }
  0x15   :  { %v90_v11 = vmul.f32 0.5, %v26_v8  ;;  %v149_v14 = vadd.f32 0.5, %v85_v3  ;;  %v150_v15 = vadd.f32 0.5, %v86_v4  ;;  %v91_v17 = vmul.f32 0.5, %v27_v12  ;;  %v29_v26 = vld [vmem:[#allocation2 + $0x40] sm:$0xff]  ;;  %v30_v27 = vld [vmem:[#allocation2 + $0x48] sm:$0xff] }
  0x16   :  { %v151_v16 = vadd.f32 0.5, %v87_v5  ;;  %v152_v18 = vadd.f32 0.5, %v88_v9  ;;  %v153_v19 = vadd.f32 0.5, %v89_v10  ;;  %v92_v21 = vmul.f32 0.5, %v28_v13  ;;  %v31_v32 = vld [vmem:[#allocation2 + $0x50] sm:$0xff]  ;;  %v32_v33 = vld [vmem:[#allocation2 + $0x58] sm:$0xff] }
  0x17   :  { %v154_v20 = vadd.f32 0.5, %v90_v11  ;;  %v213_v22 = vmax.f32 %v149_v14, 0.0  ;;  %v214_v23 = vmax.f32 %v150_v15, 0.0  ;;  %v155_v25 = vadd.f32 0.5, %v91_v17  ;;  %v33_v38 = vld [vmem:[#allocation2 + $0x60] sm:$0xff]  ;;  %v34_v39 = vld [vmem:[#allocation2 + $0x68] sm:$0xff] }
  0x18   :  { %v215_v24 = vmax.f32 %v151_v16, 0.0  ;;  %v216_v28 = vmax.f32 %v152_v18, 0.0  ;;  %v217_v29 = vmax.f32 %v153_v19, 0.0  ;;  %v156_v31 = vadd.f32 0.5, %v92_v21  ;;  %v35_v44 = vld [vmem:[#allocation2 + $0x70] sm:$0xff]  ;;  %v36_v49 = vld [vmem:[#allocation2 + $0x78] sm:$0xff] }
  0x19   :  { %v218_v30 = vmax.f32 %v154_v20, 0.0  ;;  %v277_v34 = vmin.f32 %v213_v22, 1.0  ;;  %v278_v35 = vmin.f32 %v214_v23, 1.0  ;;  %v219_v37 = vmax.f32 %v155_v25, 0.0  ;;  %v37_v2 = vld [vmem:[#allocation2 + $0x80] sm:$0xff]  ;;  %v38_v3 = vld [vmem:[#allocation2 + $0x88] sm:$0xff] }
  0x1a   :  { %v279_v36 = vmin.f32 %v215_v24, 1.0  ;;  %v280_v40 = vmin.f32 %v216_v28, 1.0  ;;  %v281_v41 = vmin.f32 %v217_v29, 1.0  ;;  %v220_v43 = vmax.f32 %v156_v31, 0.0  ;;  %v39_v8 = vld [vmem:[#allocation2 + $0x90] sm:$0xff]  ;;  %v40_v9 = vld [vmem:[#allocation2 + $0x98] sm:$0xff] }
  0x1b   :  { %v282_v42 = vmin.f32 %v218_v30, 1.0  ;;  %341 = vst [vmem:[#allocation5] sm:$0xff] %v277_v34  ;;  %342 = vst [vmem:[#allocation5 + $0x8] sm:$0xff] %v278_v35  ;;  %v283_v45 = vmin.f32 %v219_v37, 1.0  ;;  %v93_v46 = vmul.f32 0.5, %v29_v26  ;;  %v94_v47 = vmul.f32 0.5, %v30_v27 }
  0x1c   :  { %343 = vst [vmem:[#allocation5 + $0x10] sm:$0xff] %v279_v36  ;;  %v95_v48 = vmul.f32 0.5, %v31_v32  ;;  %344 = vst [vmem:[#allocation5 + $0x18] sm:$0xff] %v280_v40  ;;  %v284_v50 = vmin.f32 %v220_v43, 1.0  ;;  %v96_v51 = vmul.f32 0.5, %v32_v33  ;;  %v97_v52 = vmul.f32 0.5, %v33_v38 }
  0x1d   :  { %345 = vst [vmem:[#allocation5 + $0x20] sm:$0xff] %v281_v41  ;;  %346 = vst [vmem:[#allocation5 + $0x28] sm:$0xff] %v282_v42  ;;  %v98_v53 = vmul.f32 0.5, %v34_v39  ;;  %v157_v54 = vadd.f32 0.5, %v93_v46  ;;  %v158_v55 = vadd.f32 0.5, %v94_v47  ;;  %v99_v57 = vmul.f32 0.5, %v35_v44 }
  0x1e   :  { %347 = vst [vmem:[#allocation5 + $0x30] sm:$0xff] %v283_v45  ;;  %v159_v56 = vadd.f32 0.5, %v95_v48  ;;  %348 = vst [vmem:[#allocation5 + $0x38] sm:$0xff] %v284_v50  ;;  %v160_v58 = vadd.f32 0.5, %v96_v51  ;;  %v161_v59 = vadd.f32 0.5, %v97_v52  ;;  %v100_v61 = vmul.f32 0.5, %v36_v49 }
  0x1f   :  { %v162_v60 = vadd.f32 0.5, %v98_v53  ;;  %v221_v62 = vmax.f32 %v157_v54, 0.0  ;;  %v222_v63 = vmax.f32 %v158_v55, 0.0  ;;  %v163_v1 = vadd.f32 0.5, %v99_v57  ;;  %v41_v14 = vld [vmem:[#allocation2 + $0xa0] sm:$0xff]  ;;  %v42_v15 = vld [vmem:[#allocation2 + $0xa8] sm:$0xff] }
  0x20   :  { %v223_v0 = vmax.f32 %v159_v56, 0.0  ;;  %v224_v4 = vmax.f32 %v160_v58, 0.0  ;;  %v225_v5 = vmax.f32 %v161_v59, 0.0  ;;  %v164_v7 = vadd.f32 0.5, %v100_v61  ;;  %v43_v20 = vld [vmem:[#allocation2 + $0xb0] sm:$0xff]  ;;  %v44_v25 = vld [vmem:[#allocation2 + $0xb8] sm:$0xff] }
  0x21   :  { %v226_v6 = vmax.f32 %v162_v60, 0.0  ;;  %v285_v10 = vmin.f32 %v221_v62, 1.0  ;;  %v286_v11 = vmin.f32 %v222_v63, 1.0  ;;  %v227_v13 = vmax.f32 %v163_v1, 0.0  ;;  %v45_v42 = vld [vmem:[#allocation2 + $0xc0] sm:$0xff]  ;;  %v46_v43 = vld [vmem:[#allocation2 + $0xc8] sm:$0xff] }
  0x22   :  { %v287_v12 = vmin.f32 %v223_v0, 1.0  ;;  %v288_v16 = vmin.f32 %v224_v4, 1.0  ;;  %v289_v17 = vmin.f32 %v225_v5, 1.0  ;;  %v228_v19 = vmax.f32 %v164_v7, 0.0  ;;  %v47_v48 = vld [vmem:[#allocation2 + $0xd0] sm:$0xff]  ;;  %v48_v49 = vld [vmem:[#allocation2 + $0xd8] sm:$0xff] }
  0x23   :  { %v290_v18 = vmin.f32 %v226_v6, 1.0  ;;  %349 = vst [vmem:[#allocation5 + $0x40] sm:$0xff] %v285_v10  ;;  %350 = vst [vmem:[#allocation5 + $0x48] sm:$0xff] %v286_v11  ;;  %v291_v21 = vmin.f32 %v227_v13, 1.0  ;;  %v101_v22 = vmul.f32 0.5, %v37_v2  ;;  %v102_v23 = vmul.f32 0.5, %v38_v3 }
  0x24   :  { %351 = vst [vmem:[#allocation5 + $0x50] sm:$0xff] %v287_v12  ;;  %v103_v24 = vmul.f32 0.5, %v39_v8  ;;  %352 = vst [vmem:[#allocation5 + $0x58] sm:$0xff] %v288_v16  ;;  %v292_v26 = vmin.f32 %v228_v19, 1.0  ;;  %v104_v27 = vmul.f32 0.5, %v40_v9  ;;  %v105_v28 = vmul.f32 0.5, %v41_v14 }
  0x25   :  { %353 = vst [vmem:[#allocation5 + $0x60] sm:$0xff] %v289_v17  ;;  %354 = vst [vmem:[#allocation5 + $0x68] sm:$0xff] %v290_v18  ;;  %v106_v29 = vmul.f32 0.5, %v42_v15  ;;  %v165_v30 = vadd.f32 0.5, %v101_v22  ;;  %v166_v31 = vadd.f32 0.5, %v102_v23  ;;  %v107_v33 = vmul.f32 0.5, %v43_v20 }
  0x26   :  { %355 = vst [vmem:[#allocation5 + $0x70] sm:$0xff] %v291_v21  ;;  %v167_v32 = vadd.f32 0.5, %v103_v24  ;;  %356 = vst [vmem:[#allocation5 + $0x78] sm:$0xff] %v292_v26  ;;  %v168_v34 = vadd.f32 0.5, %v104_v27  ;;  %v169_v35 = vadd.f32 0.5, %v105_v28  ;;  %v108_v37 = vmul.f32 0.5, %v44_v25 }
  0x27   :  { %v170_v36 = vadd.f32 0.5, %v106_v29  ;;  %v229_v38 = vmax.f32 %v165_v30, 0.0  ;;  %v230_v39 = vmax.f32 %v166_v31, 0.0  ;;  %v171_v41 = vadd.f32 0.5, %v107_v33  ;;  %v49_v54 = vld [vmem:[#allocation2 + $0xe0] sm:$0xff]  ;;  %v50_v55 = vld [vmem:[#allocation2 + $0xe8] sm:$0xff] }
  0x28   :  { %v231_v40 = vmax.f32 %v167_v32, 0.0  ;;  %v232_v44 = vmax.f32 %v168_v34, 0.0  ;;  %v233_v45 = vmax.f32 %v169_v35, 0.0  ;;  %v172_v47 = vadd.f32 0.5, %v108_v37  ;;  %v51_v60 = vld [vmem:[#allocation2 + $0xf0] sm:$0xff]  ;;  %v52_v1 = vld [vmem:[#allocation2 + $0xf8] sm:$0xff] }
  0x29   :  { %v234_v46 = vmax.f32 %v170_v36, 0.0  ;;  %v293_v50 = vmin.f32 %v229_v38, 1.0  ;;  %v294_v51 = vmin.f32 %v230_v39, 1.0  ;;  %v235_v53 = vmax.f32 %v171_v41, 0.0  ;;  %v53_v18 = vld [vmem:[#allocation2 + $0x100] sm:$0xff]  ;;  %v54_v19 = vld [vmem:[#allocation2 + $0x108] sm:$0xff] }
  0x2a   :  { %v295_v52 = vmin.f32 %v231_v40, 1.0  ;;  %v296_v56 = vmin.f32 %v232_v44, 1.0  ;;  %v297_v57 = vmin.f32 %v233_v45, 1.0  ;;  %v236_v59 = vmax.f32 %v172_v47, 0.0  ;;  %v55_v24 = vld [vmem:[#allocation2 + $0x110] sm:$0xff]  ;;  %v56_v25 = vld [vmem:[#allocation2 + $0x118] sm:$0xff] }
  0x2b   :  { %v298_v58 = vmin.f32 %v234_v46, 1.0  ;;  %357 = vst [vmem:[#allocation5 + $0x80] sm:$0xff] %v293_v50  ;;  %358 = vst [vmem:[#allocation5 + $0x88] sm:$0xff] %v294_v51  ;;  %v299_v61 = vmin.f32 %v235_v53, 1.0  ;;  %v109_v62 = vmul.f32 0.5, %v45_v42  ;;  %v110_v63 = vmul.f32 0.5, %v46_v43 }
  0x2c   :  { %359 = vst [vmem:[#allocation5 + $0x90] sm:$0xff] %v295_v52  ;;  %v111_v0 = vmul.f32 0.5, %v47_v48  ;;  %360 = vst [vmem:[#allocation5 + $0x98] sm:$0xff] %v296_v56  ;;  %v300_v2 = vmin.f32 %v236_v59, 1.0  ;;  %v112_v3 = vmul.f32 0.5, %v48_v49  ;;  %v113_v4 = vmul.f32 0.5, %v49_v54 }
  0x2d   :  { %361 = vst [vmem:[#allocation5 + $0xa0] sm:$0xff] %v297_v57  ;;  %362 = vst [vmem:[#allocation5 + $0xa8] sm:$0xff] %v298_v58  ;;  %v114_v5 = vmul.f32 0.5, %v50_v55  ;;  %v173_v6 = vadd.f32 0.5, %v109_v62  ;;  %v174_v7 = vadd.f32 0.5, %v110_v63  ;;  %v115_v9 = vmul.f32 0.5, %v51_v60 }
  0x2e   :  { %363 = vst [vmem:[#allocation5 + $0xb0] sm:$0xff] %v299_v61  ;;  %v175_v8 = vadd.f32 0.5, %v111_v0  ;;  %364 = vst [vmem:[#allocation5 + $0xb8] sm:$0xff] %v300_v2  ;;  %v176_v10 = vadd.f32 0.5, %v112_v3  ;;  %v177_v11 = vadd.f32 0.5, %v113_v4  ;;  %v116_v13 = vmul.f32 0.5, %v52_v1 }
  0x2f   :  { %v178_v12 = vadd.f32 0.5, %v114_v5  ;;  %v237_v14 = vmax.f32 %v173_v6, 0.0  ;;  %v238_v15 = vmax.f32 %v174_v7, 0.0  ;;  %v179_v17 = vadd.f32 0.5, %v115_v9  ;;  %v57_v30 = vld [vmem:[#allocation2 + $0x120] sm:$0xff]  ;;  %v58_v31 = vld [vmem:[#allocation2 + $0x128] sm:$0xff] }
  0x30   :  { %v239_v16 = vmax.f32 %v175_v8, 0.0  ;;  %v240_v20 = vmax.f32 %v176_v10, 0.0  ;;  %v241_v21 = vmax.f32 %v177_v11, 0.0  ;;  %v180_v23 = vadd.f32 0.5, %v116_v13  ;;  %v59_v36 = vld [vmem:[#allocation2 + $0x130] sm:$0xff]  ;;  %v60_v41 = vld [vmem:[#allocation2 + $0x138] sm:$0xff] }
  0x31   :  { %v242_v22 = vmax.f32 %v178_v12, 0.0  ;;  %v301_v26 = vmin.f32 %v237_v14, 1.0  ;;  %v302_v27 = vmin.f32 %v238_v15, 1.0  ;;  %v243_v29 = vmax.f32 %v179_v17, 0.0  ;;  %v61_v58 = vld [vmem:[#allocation2 + $0x140] sm:$0xff]  ;;  %v62_v59 = vld [vmem:[#allocation2 + $0x148] sm:$0xff] }
  0x32   :  { %v303_v28 = vmin.f32 %v239_v16, 1.0  ;;  %v304_v32 = vmin.f32 %v240_v20, 1.0  ;;  %v305_v33 = vmin.f32 %v241_v21, 1.0  ;;  %v244_v35 = vmax.f32 %v180_v23, 0.0  ;;  %v63_v0 = vld [vmem:[#allocation2 + $0x150] sm:$0xff]  ;;  %v64_v1 = vld [vmem:[#allocation2 + $0x158] sm:$0xff] }
  0x33   :  { %v306_v34 = vmin.f32 %v242_v22, 1.0  ;;  %365 = vst [vmem:[#allocation5 + $0xc0] sm:$0xff] %v301_v26  ;;  %366 = vst [vmem:[#allocation5 + $0xc8] sm:$0xff] %v302_v27  ;;  %v307_v37 = vmin.f32 %v243_v29, 1.0  ;;  %v117_v38 = vmul.f32 0.5, %v53_v18  ;;  %v118_v39 = vmul.f32 0.5, %v54_v19 }
  0x34   :  { %367 = vst [vmem:[#allocation5 + $0xd0] sm:$0xff] %v303_v28  ;;  %v119_v40 = vmul.f32 0.5, %v55_v24  ;;  %368 = vst [vmem:[#allocation5 + $0xd8] sm:$0xff] %v304_v32  ;;  %v308_v42 = vmin.f32 %v244_v35, 1.0  ;;  %v120_v43 = vmul.f32 0.5, %v56_v25  ;;  %v121_v44 = vmul.f32 0.5, %v57_v30 }
  0x35   :  { %369 = vst [vmem:[#allocation5 + $0xe0] sm:$0xff] %v305_v33  ;;  %370 = vst [vmem:[#allocation5 + $0xe8] sm:$0xff] %v306_v34  ;;  %v122_v45 = vmul.f32 0.5, %v58_v31  ;;  %v181_v46 = vadd.f32 0.5, %v117_v38  ;;  %v182_v47 = vadd.f32 0.5, %v118_v39  ;;  %v123_v49 = vmul.f32 0.5, %v59_v36 }
  0x36   :  { %371 = vst [vmem:[#allocation5 + $0xf0] sm:$0xff] %v307_v37  ;;  %v183_v48 = vadd.f32 0.5, %v119_v40  ;;  %372 = vst [vmem:[#allocation5 + $0xf8] sm:$0xff] %v308_v42  ;;  %v184_v50 = vadd.f32 0.5, %v120_v43  ;;  %v185_v51 = vadd.f32 0.5, %v121_v44  ;;  %v124_v53 = vmul.f32 0.5, %v60_v41 }
  0x37   :  { %v186_v52 = vadd.f32 0.5, %v122_v45  ;;  %v245_v54 = vmax.f32 %v181_v46, 0.0  ;;  %v246_v55 = vmax.f32 %v182_v47, 0.0  ;;  %v187_v57 = vadd.f32 0.5, %v123_v49  ;;  %v65_v6 = vld [vmem:[#allocation2 + $0x160] sm:$0xff]  ;;  %v66_v7 = vld [vmem:[#allocation2 + $0x168] sm:$0xff] }
  0x38   :  { %v247_v56 = vmax.f32 %v183_v48, 0.0  ;;  %v248_v60 = vmax.f32 %v184_v50, 0.0  ;;  %v249_v61 = vmax.f32 %v185_v51, 0.0  ;;  %v188_v63 = vadd.f32 0.5, %v124_v53  ;;  %v67_v12 = vld [vmem:[#allocation2 + $0x170] sm:$0xff]  ;;  %v68_v17 = vld [vmem:[#allocation2 + $0x178] sm:$0xff] }
  0x39   :  { %v250_v62 = vmax.f32 %v186_v52, 0.0  ;;  %v309_v2 = vmin.f32 %v245_v54, 1.0  ;;  %v310_v3 = vmin.f32 %v246_v55, 1.0  ;;  %v251_v5 = vmax.f32 %v187_v57, 0.0  ;;  %v69_v34 = vld [vmem:[#allocation2 + $0x180] sm:$0xff]  ;;  %v70_v35 = vld [vmem:[#allocation2 + $0x188] sm:$0xff] }
  0x3a   :  { %v311_v4 = vmin.f32 %v247_v56, 1.0  ;;  %v312_v8 = vmin.f32 %v248_v60, 1.0  ;;  %v313_v9 = vmin.f32 %v249_v61, 1.0  ;;  %v252_v11 = vmax.f32 %v188_v63, 0.0  ;;  %v71_v40 = vld [vmem:[#allocation2 + $0x190] sm:$0xff]  ;;  %v72_v41 = vld [vmem:[#allocation2 + $0x198] sm:$0xff] }
  0x3b   :  { %v314_v10 = vmin.f32 %v250_v62, 1.0  ;;  %373 = vst [vmem:[#allocation5 + $0x100] sm:$0xff] %v309_v2  ;;  %374 = vst [vmem:[#allocation5 + $0x108] sm:$0xff] %v310_v3  ;;  %v315_v13 = vmin.f32 %v251_v5, 1.0  ;;  %v125_v14 = vmul.f32 0.5, %v61_v58  ;;  %v126_v15 = vmul.f32 0.5, %v62_v59 }
  0x3c   :  { %375 = vst [vmem:[#allocation5 + $0x110] sm:$0xff] %v311_v4  ;;  %v127_v16 = vmul.f32 0.5, %v63_v0  ;;  %376 = vst [vmem:[#allocation5 + $0x118] sm:$0xff] %v312_v8  ;;  %v316_v18 = vmin.f32 %v252_v11, 1.0  ;;  %v128_v19 = vmul.f32 0.5, %v64_v1  ;;  %v129_v20 = vmul.f32 0.5, %v65_v6 }
  0x3d   :  { %377 = vst [vmem:[#allocation5 + $0x120] sm:$0xff] %v313_v9  ;;  %378 = vst [vmem:[#allocation5 + $0x128] sm:$0xff] %v314_v10  ;;  %v130_v21 = vmul.f32 0.5, %v66_v7  ;;  %v189_v22 = vadd.f32 0.5, %v125_v14  ;;  %v190_v23 = vadd.f32 0.5, %v126_v15  ;;  %v131_v25 = vmul.f32 0.5, %v67_v12 }
  0x3e   :  { %379 = vst [vmem:[#allocation5 + $0x130] sm:$0xff] %v315_v13  ;;  %v191_v24 = vadd.f32 0.5, %v127_v16  ;;  %380 = vst [vmem:[#allocation5 + $0x138] sm:$0xff] %v316_v18  ;;  %v192_v26 = vadd.f32 0.5, %v128_v19  ;;  %v193_v27 = vadd.f32 0.5, %v129_v20  ;;  %v132_v29 = vmul.f32 0.5, %v68_v17 }
  0x3f   :  { %v194_v28 = vadd.f32 0.5, %v130_v21  ;;  %v253_v30 = vmax.f32 %v189_v22, 0.0  ;;  %v254_v31 = vmax.f32 %v190_v23, 0.0  ;;  %v195_v33 = vadd.f32 0.5, %v131_v25  ;;  %v73_v46 = vld [vmem:[#allocation2 + $0x1a0] sm:$0xff]  ;;  %v74_v47 = vld [vmem:[#allocation2 + $0x1a8] sm:$0xff] }
  0x40   :  { %v255_v32 = vmax.f32 %v191_v24, 0.0  ;;  %v256_v36 = vmax.f32 %v192_v26, 0.0  ;;  %v257_v37 = vmax.f32 %v193_v27, 0.0  ;;  %v196_v39 = vadd.f32 0.5, %v132_v29  ;;  %v75_v52 = vld [vmem:[#allocation2 + $0x1b0] sm:$0xff]  ;;  %v76_v57 = vld [vmem:[#allocation2 + $0x1b8] sm:$0xff] }
  0x41   :  { %v258_v38 = vmax.f32 %v194_v28, 0.0  ;;  %v317_v42 = vmin.f32 %v253_v30, 1.0  ;;  %v318_v43 = vmin.f32 %v254_v31, 1.0  ;;  %v259_v45 = vmax.f32 %v195_v33, 0.0  ;;  %v77_v10 = vld [vmem:[#allocation2 + $0x1c0] sm:$0xff]  ;;  %v78_v11 = vld [vmem:[#allocation2 + $0x1c8] sm:$0xff] }
  0x42   :  { %v319_v44 = vmin.f32 %v255_v32, 1.0  ;;  %v320_v48 = vmin.f32 %v256_v36, 1.0  ;;  %v321_v49 = vmin.f32 %v257_v37, 1.0  ;;  %v260_v51 = vmax.f32 %v196_v39, 0.0  ;;  %v79_v16 = vld [vmem:[#allocation2 + $0x1d0] sm:$0xff]  ;;  %v80_v17 = vld [vmem:[#allocation2 + $0x1d8] sm:$0xff] }
  0x43   :  { %v322_v50 = vmin.f32 %v258_v38, 1.0  ;;  %381 = vst [vmem:[#allocation5 + $0x140] sm:$0xff] %v317_v42  ;;  %382 = vst [vmem:[#allocation5 + $0x148] sm:$0xff] %v318_v43  ;;  %v323_v53 = vmin.f32 %v259_v45, 1.0  ;;  %v133_v54 = vmul.f32 0.5, %v69_v34  ;;  %v134_v55 = vmul.f32 0.5, %v70_v35 }
  0x44   :  { %383 = vst [vmem:[#allocation5 + $0x150] sm:$0xff] %v319_v44  ;;  %v135_v56 = vmul.f32 0.5, %v71_v40  ;;  %384 = vst [vmem:[#allocation5 + $0x158] sm:$0xff] %v320_v48  ;;  %v324_v58 = vmin.f32 %v260_v51, 1.0  ;;  %v136_v59 = vmul.f32 0.5, %v72_v41  ;;  %v137_v60 = vmul.f32 0.5, %v73_v46 }
  0x45   :  { %385 = vst [vmem:[#allocation5 + $0x160] sm:$0xff] %v321_v49  ;;  %386 = vst [vmem:[#allocation5 + $0x168] sm:$0xff] %v322_v50  ;;  %v138_v61 = vmul.f32 0.5, %v74_v47  ;;  %v197_v62 = vadd.f32 0.5, %v133_v54  ;;  %v198_v63 = vadd.f32 0.5, %v134_v55  ;;  %v139_v1 = vmul.f32 0.5, %v75_v52 }
  0x46   :  { %387 = vst [vmem:[#allocation5 + $0x170] sm:$0xff] %v323_v53  ;;  %v199_v0 = vadd.f32 0.5, %v135_v56  ;;  %388 = vst [vmem:[#allocation5 + $0x178] sm:$0xff] %v324_v58  ;;  %v200_v2 = vadd.f32 0.5, %v136_v59  ;;  %v201_v3 = vadd.f32 0.5, %v137_v60  ;;  %v140_v5 = vmul.f32 0.5, %v76_v57 }
  0x47   :  { %v202_v4 = vadd.f32 0.5, %v138_v61  ;;  %v261_v6 = vmax.f32 %v197_v62, 0.0  ;;  %v262_v7 = vmax.f32 %v198_v63, 0.0  ;;  %v203_v9 = vadd.f32 0.5, %v139_v1  ;;  %v81_v22 = vld [vmem:[#allocation2 + $0x1e0] sm:$0xff]  ;;  %v82_v23 = vld [vmem:[#allocation2 + $0x1e8] sm:$0xff] }
  0x48   :  { %v263_v8 = vmax.f32 %v199_v0, 0.0  ;;  %v264_v12 = vmax.f32 %v200_v2, 0.0  ;;  %v265_v13 = vmax.f32 %v201_v3, 0.0  ;;  %v204_v15 = vadd.f32 0.5, %v140_v5  ;;  %v83_v28 = vld [vmem:[#allocation2 + $0x1f0] sm:$0xff]  ;;  %v84_v33 = vld [vmem:[#allocation2 + $0x1f8] sm:$0xff] }
  0x49   :  { %v266_v14 = vmax.f32 %v202_v4, 0.0  ;;  %v325_v18 = vmin.f32 %v261_v6, 1.0  ;;  %v326_v19 = vmin.f32 %v262_v7, 1.0  ;;  %v267_v21 = vmax.f32 %v203_v9, 0.0  ;;  %s444_s19 = scalar_lea.vmem %s412_s18, 8192 }
  0x4a   :  { %v327_v20 = vmin.f32 %v263_v8, 1.0  ;;  %v328_v24 = vmin.f32 %v264_v12, 1.0  ;;  %v329_v25 = vmin.f32 %v265_v13, 1.0  ;;  %v268_v27 = vmax.f32 %v204_v15, 0.0  ;;  %p445_p8 = scmp.ne.s32.totalorder %s412_s18, %s444_s19  ;;  %p450_p10 = scmp.lt.s32.totalorder %s444_s19, %s444_s19 }
  0x4b   :  { %v330_v26 = vmin.f32 %v266_v14, 1.0  ;;  %389 = vst [vmem:[#allocation5 + $0x180] sm:$0xff] %v325_v18  ;;  %390 = vst [vmem:[#allocation5 + $0x188] sm:$0xff] %v326_v19  ;;  %v331_v29 = vmin.f32 %v267_v21, 1.0  ;;  %v141_v30 = vmul.f32 0.5, %v77_v10  ;;  %v142_v31 = vmul.f32 0.5, %v78_v11 }
  0x4c   :  { %391 = vst [vmem:[#allocation5 + $0x190] sm:$0xff] %v327_v20  ;;  %v143_v32 = vmul.f32 0.5, %v79_v16  ;;  %392 = vst [vmem:[#allocation5 + $0x198] sm:$0xff] %v328_v24  ;;  %v332_v34 = vmin.f32 %v268_v27, 1.0  ;;  %v144_v35 = vmul.f32 0.5, %v80_v17  ;;  %v145_v36 = vmul.f32 0.5, %v81_v22  ;;  %p451_p11 = por %p450_p10, %p449_p9 }
  0x4d   :  { %393 = vst [vmem:[#allocation5 + $0x1a0] sm:$0xff] %v329_v25  ;;  %394 = vst [vmem:[#allocation5 + $0x1a8] sm:$0xff] %v330_v26  ;;  %v146_v37 = vmul.f32 0.5, %v82_v23  ;;  %v205_v38 = vadd.f32 0.5, %v141_v30  ;;  %v206_v39 = vadd.f32 0.5, %v142_v31  ;;  %v147_v41 = vmul.f32 0.5, %v83_v28 }
  0x4e   :  { %395 = vst [vmem:[#allocation5 + $0x1b0] sm:$0xff] %v331_v29  ;;  %v207_v40 = vadd.f32 0.5, %v143_v32  ;;  %396 = vst [vmem:[#allocation5 + $0x1b8] sm:$0xff] %v332_v34  ;;  %v208_v42 = vadd.f32 0.5, %v144_v35  ;;  %v209_v43 = vadd.f32 0.5, %v145_v36  ;;  %v148_v45 = vmul.f32 0.5, %v84_v33  ;;  %p452_p12 = pnand %p451_p11, %p445_p8 }
  0x4f   :  { %v210_v44 = vadd.f32 0.5, %v146_v37  ;;  %v269_v46 = vmax.f32 %v205_v38, 0.0  ;;  %v270_v47 = vmax.f32 %v206_v39, 0.0  ;;  %v211_v49 = vadd.f32 0.5, %v147_v41 }
  0x50   :  { %v271_v48 = vmax.f32 %v207_v40, 0.0  ;;  %v272_v50 = vmax.f32 %v208_v42, 0.0  ;;  %v273_v51 = vmax.f32 %v209_v43, 0.0  ;;  %v212_v53 = vadd.f32 0.5, %v148_v45 }
  0x51   :  { %v274_v52 = vmax.f32 %v210_v44, 0.0  ;;  %v333_v54 = vmin.f32 %v269_v46, 1.0  ;;  %v334_v55 = vmin.f32 %v270_v47, 1.0  ;;  %v275_v57 = vmax.f32 %v211_v49, 0.0 }
  0x52   :  { %v335_v56 = vmin.f32 %v271_v48, 1.0  ;;  %v336_v58 = vmin.f32 %v272_v50, 1.0  ;;  %v337_v59 = vmin.f32 %v273_v51, 1.0  ;;  %v276_v61 = vmax.f32 %v212_v53, 0.0 }
  0x53   :  { %v338_v60 = vmin.f32 %v274_v52, 1.0  ;;  %397 = vst [vmem:[#allocation5 + $0x1c0] sm:$0xff] %v333_v54  ;;  %398 = vst [vmem:[#allocation5 + $0x1c8] sm:$0xff] %v334_v55  ;;  %v339_v62 = vmin.f32 %v275_v57, 1.0 }
  0x54   :  { %399 = vst [vmem:[#allocation5 + $0x1d0] sm:$0xff] %v335_v56  ;;  %400 = vst [vmem:[#allocation5 + $0x1d8] sm:$0xff] %v336_v58  ;;  %v340_v63 = vmin.f32 %v276_v61, 1.0 }
  0x55   :  { %401 = vst [vmem:[#allocation5 + $0x1e0] sm:$0xff] %v337_v59  ;;  %402 = vst [vmem:[#allocation5 + $0x1e8] sm:$0xff] %v338_v60 }
  0x56   :  { %403 = vst [vmem:[#allocation5 + $0x1f0] sm:$0xff] %v339_v62  ;;  %404 = vst [vmem:[#allocation5 + $0x1f8] sm:$0xff] %v340_v63 }
  0x57   :  { %455 = shalt.err (!%p452_p12)
}
  0x58   :  { %s456_s22 = scalar_lea.hbm %s507_s1, 8192 }
  0x59   :  { %p457_p13 = scmp.ne.s32.totalorder %s507_s1, %s456_s22  ;;  %p460_p0 = scmp.lt.u32.totalorder %s456_s22, %s507_s1 }
  0x5b   :  { %p462_p1 = pnand %p460_p0, %p457_p13 }
  0x5d   :  { %465 = shalt.err (!%p462_p1)
}
  0x5e   :  { %414 = dma.vmem_to_hbm [thread:$0]  %s412_s18, 8192, %s507_s1, [#allocation4]  }
  0x5f   :  { %468 = dma.done.wait [#allocation4], 8192  }
  0x60   :  { %469 = vsyncadd [#allocation4], 4294959104 }
  0x61   :  { %418 = vsyncpa [#allocation3], 1 }
  0x62   :  { %419 = vsyncpa [#allocation4], 1 }

</bundles_post_ra>
